<compile_context>
chip_gen: v7x
topology: tpu7x:2x2x1
jax: 0.10.0
libtpu: 0.0.40
codegen_flags: <defaults>
</compile_context>

<pallas_src>
import functools
import math

import jax
import jax.numpy as jnp
from jax.experimental import pallas as pl
from jax.experimental.pallas import tpu as pltpu


def _round_up(x, m):
    return (x + m - 1) // m * m


def _vmem_budget_bytes():
    """~50% of this generation's per-core VMEM (conservative 64 MiB fallback)."""
    try:
        cap = int(getattr(pltpu.get_tpu_info(), "vmem_capacity_bytes", 64 << 20))
    except Exception:
        cap = 64 << 20
    return max(cap // 2, 16 << 20)


def _pick_m_tile(M, max_tile=512):
    """(tm, Mp): tm % 16 == 0 (bf16 sublane packing) and tm divides Mp."""
    Mp = _round_up(M, 16)
    if Mp <= max_tile:
        return Mp, Mp
    for cand in (512, 256, 128):          # exact divisor -> no row padding
        if M % cand == 0:
            return cand, M
    best_t, best_p = None, None           # otherwise minimise padded rows,
    for cand in (512, 256, 128):          # ties go to the larger tile
        p = _round_up(M, cand)
        if best_p is None or p < best_p:
            best_t, best_p = cand, p
    return best_t, best_p


def _pick_k_tile(K):
    """Contraction tile: full K (single step, no accumulator) unless K is big."""
    if K <= 1024:
        return K
    for cand in (512, 256, 128):
        if K % cand == 0:
            return cand
    return K


def _pick_n_tile(Np, tm, tk, kt, out_bytes, budget):
    """Largest lane tile (ideally full Np -> weights resident, x streamed once)
    whose double-buffered working set fits the VMEM budget."""
    for tn in (Np, 2048, 1024, 512, 256, 128):
        if tn > Np or Np % tn:
            continue
        need = 2 * (tm * tk * 2 + tk * tn * 2 + tm * tn * out_bytes + tn * 4)
        if kt > 1:
            need += tm * tn * 4
        if need <= budget:
            return tn
    return 128


def _matmul_bias_kernel(x_ref, wt_ref, b_ref, o_ref):
    # Single contraction step: o = x @ W^T + b (bf16 MXU, f32 acc, direct store).
    acc = jnp.dot(x_ref[...], wt_ref[...], preferred_element_type=jnp.float32)
    o_ref[...] = (acc + b_ref[...]).astype(o_ref.dtype)


def _matmul_bias_acc_kernel(x_ref, wt_ref, b_ref, o_ref, acc_ref):
    # Multi-step contraction: f32 VMEM accumulator over the innermost K axis.
    k = pl.program_id(2)

    @pl.when(k == 0)
    def _init():
        acc_ref[...] = jnp.zeros_like(acc_ref)

    acc_ref[...] += jnp.dot(x_ref[...], wt_ref[...],
                            preferred_element_type=jnp.float32)

    @pl.when(k == pl.num_programs(2) - 1)
    def _finalize():
        o_ref[...] = (acc_ref[...] + b_ref[...]).astype(o_ref.dtype)


@jax.jit
def linear_bias(x2d, wt, b_row):
    """y = x2d @ wt + b over the full padded Nout = wt.shape[1].

    x2d:   (M, K)           activations (cast to bf16 at the kernel boundary)
    wt:    (K, Np)  bf16    pre-transposed, lane-padded weight (Np % 128 == 0)
    b_row: (1, Np)  f32     bias (added to the f32 accumulator)
    Returns (M, Np) in x2d.dtype.
    """
    M, K = x2d.shape
    Np = wt.shape[1]
    out_dtype = x2d.dtype
    out_bytes = jnp.dtype(out_dtype).itemsize

    xb = x2d.astype(jnp.bfloat16)
    wt = wt.astype(jnp.bfloat16)       # no-op: stored bf16 at construction
    b_row = b_row.astype(jnp.float32)

    budget = _vmem_budget_bytes()
    tm, Mp = _pick_m_tile(M)
    tk = _pick_k_tile(K)
    kt = K // tk
    tn = _pick_n_tile(Np, tm, tk, kt, out_bytes, budget)

    # v7x has two TensorCores: keep >= 2 tiles on the "parallel" axes when the
    # tile sizes allow it (harmless extra grid step on v5e/v6e).
    if (Mp // tm) * (Np // tn) == 1:
        if tm >= 32 and (tm // 2) % 16 == 0:
            tm //= 2
        elif tn % 256 == 0:
            tn //= 2

    if Mp != M:
        xb = jnp.pad(xb, ((0, Mp - M), (0, 0)))

    # Double-buffered bf16 x/W tiles + out tile + bias (+ f32 acc if kt > 1).
    vmem_needed = 2 * (tm * tk * 2 + tk * tn * 2 + tm * tn * out_bytes + tn * 4)
    if kt > 1:
        vmem_needed += tm * tn * 4
    vmem_limit = int(min(max(2 * vmem_needed, 16 << 20), budget))

    cost = pl.CostEstimate(
        flops=2 * Mp * K * Np,
        transcendentals=0,
        bytes_accessed=(Mp * K * 2 * (Np // tn)     # x, re-read per column slab
                        + K * Np * 2 * (Mp // tm)   # W, re-read per row slab
                        + Mp * Np * out_bytes       # output
                        + Np * 4),                  # bias
    )

    if kt == 1:
        out = pl.pallas_call(
            _matmul_bias_kernel,
            out_shape=jax.ShapeDtypeStruct((Mp, Np), out_dtype),
            grid_spec=pltpu.PrefetchScalarGridSpec(
                num_scalar_prefetch=0,
                grid=(Mp // tm, Np // tn),
                in_specs=[
                    pl.BlockSpec((tm, K), lambda i, j: (i, 0)),    # x tile
                    pl.BlockSpec((K, tn), lambda i, j: (0, j)),    # W^T tile
                    pl.BlockSpec((1, tn), lambda i, j: (0, j)),    # bias tile
                ],
                out_specs=pl.BlockSpec((tm, tn), lambda i, j: (i, j)),
            ),
            compiler_params=pltpu.CompilerParams(
                dimension_semantics=("parallel", "parallel"),
                vmem_limit_bytes=vmem_limit),
            cost_estimate=cost,
        )(xb, wt, b_row)
    else:
        out = pl.pallas_call(
            _matmul_bias_acc_kernel,
            out_shape=jax.ShapeDtypeStruct((Mp, Np), out_dtype),
            grid_spec=pltpu.PrefetchScalarGridSpec(
                num_scalar_prefetch=0,
                grid=(Mp // tm, Np // tn, kt),
                in_specs=[
                    pl.BlockSpec((tm, tk), lambda i, j, k: (i, k)),
                    pl.BlockSpec((tk, tn), lambda i, j, k: (k, j)),
                    pl.BlockSpec((1, tn), lambda i, j, k: (0, j)),
                ],
                out_specs=pl.BlockSpec((tm, tn), lambda i, j, k: (i, j)),
                scratch_shapes=[pltpu.VMEM((tm, tn), jnp.float32)],
            ),
            compiler_params=pltpu.CompilerParams(
                dimension_semantics=("parallel", "parallel", "arbitrary"),
                vmem_limit_bytes=vmem_limit),
            cost_estimate=cost,
        )(xb, wt, b_row)

    if Mp != M:
        out = out[:M]
    return out


def _pad_cols(a, n_to):
    n = a.shape[1]
    if n == n_to:
        return a
    return jnp.pad(a, ((0, 0), (0, n_to - n)))


def _prep_segments(w_rows_list, b_list, seg_pad):
    """torch-layout (nout_i, K) weights + (nout_i,) biases ->
    bf16 (K, n_segs*seg_pad) pre-transposed weight and f32 (1, ...) bias, every
    output segment lane-padded to `seg_pad` (a 128 multiple)."""
    wt = jnp.concatenate([_pad_cols(w.T, seg_pad) for w in w_rows_list], axis=1)
    b = jnp.concatenate([_pad_cols(b.reshape(1, -1), seg_pad) for b in b_list],
                        axis=1)
    return wt.astype(jnp.bfloat16), b.astype(jnp.float32)


class LinearProjection:
    """JAX/Pallas port of the PyTorch LinearProjection module.

    Requires dim == heads * dim_head (the reference reshape implies it).
    Dropout is declared in the reference but never applied in forward.
    """

    def __init__(self, dim, heads=8, dim_head=64, dropout=0.0, bias=True, *, key):
        inner_dim = dim_head * heads
        self.dim = dim
        self.heads = heads
        self.inner_dim = inner_dim
        self.inner_pad = _round_up(inner_dim, 128)
        self.use_bias = bias

        kq_w, kq_b, kkv_w, kkv_b = jax.random.split(key, 4)
        bound = 1.0 / math.sqrt(dim)  # nn.Linear default init bound
        # torch-layout f32 parameters (kept for the pure-JAX reference).
        self.wq = jax.random.uniform(kq_w, (inner_dim, dim), jnp.float32, -bound, bound)
        self.bq = (jax.random.uniform(kq_b, (inner_dim,), jnp.float32, -bound, bound)
                   if bias else jnp.zeros((inner_dim,), jnp.float32))
        self.wkv = jax.random.uniform(kkv_w, (2 * inner_dim, dim), jnp.float32, -bound, bound)
        self.bkv = (jax.random.uniform(kkv_b, (2 * inner_dim,), jnp.float32, -bound, bound)
                    if bias else jnp.zeros((2 * inner_dim,), jnp.float32))

        # Kernel-friendly layouts, built ONCE (no per-forward transpose/cast):
        # bf16 (K, Nout) weights, each output segment padded to a 128 multiple.
        wk, wv = self.wkv[:inner_dim], self.wkv[inner_dim:]
        bk, bv = self.bkv[:inner_dim], self.bkv[inner_dim:]
        self.wq_t, self.bq_row = _prep_segments([self.wq], [self.bq], self.inner_pad)
        self.wkv_t, self.bkv_row = _prep_segments([wk, wv], [bk, bv], self.inner_pad)
        # Fused [q | k | v] weight for the self-attention path: one matmul,
        # x streamed from HBM once, lane-dense segment-aligned output.
        self.wqkv_t, self.bqkv_row = _prep_segments(
            [self.wq, wk, wv], [self.bq, bk, bv], self.inner_pad)

    def _split_heads(self, y2d, B_, N):
        d = self.dim // self.heads
        # Same values as torch's reshape(B,N,·,heads,d).permute(2,0,3,1,4)[i].
        return y2d.reshape(B_, N, self.heads, d).transpose(0, 2, 1, 3)

    def __call__(self, x, attn_kv=None):
        B_, N, C = x.shape
        d = C // self.heads
        inner, ipad = self.inner_dim, self.inner_pad

        if attn_kv is None:
            # Self-attention: one fused [q|k|v] projection over (B*N, C).
            qkv = linear_bias(x.reshape(B_ * N, C), self.wqkv_t, self.bqkv_row)
            # Segment-aligned slices fuse into the head-split transpose glue.
            q = self._split_heads(qkv[:, :inner], B_, N)
            k = self._split_heads(qkv[:, ipad:ipad + inner], B_, N)
            v = self._split_heads(qkv[:, 2 * ipad:2 * ipad + inner], B_, N)
            return q, k, v

        # Cross-attention: attn_kv is (N_kv, C), identical across batch in the
        # reference (unsqueeze + repeat).  Project it ONCE, then broadcast the
        # *output* lazily over B (no physical (B, N_kv, 2*inner) copies).
        q = self._split_heads(
            linear_bias(x.reshape(B_ * N, C), self.wq_t, self.bq_row)[:, :inner],
            B_, N)
        N_kv = attn_kv.shape[0]
        kv = linear_bias(attn_kv, self.wkv_t, self.bkv_row)       # (N_kv, 2*ipad)
        k1 = kv[:, :inner].reshape(N_kv, self.heads, d).transpose(1, 0, 2)
        v1 = kv[:, ipad:ipad + inner].reshape(N_kv, self.heads, d).transpose(1, 0, 2)
        k = jnp.broadcast_to(k1[None], (B_, self.heads, N_kv, d))
        v = jnp.broadcast_to(v1[None], (B_, self.heads, N_kv, d))
        return q, k, v


def _reference(x, mod, attn_kv=None):
    """Pure-JAX reference of the PyTorch forward.  Matmuls use bf16 inputs with
    f32 accumulation to mirror the kernel's MXU numerics; structure is identical
    to the torch code (repeat attn_kv over batch, project, reshape, permute)."""
    B_, N, C = x.shape
    akv = x if attn_kv is None else jnp.broadcast_to(attn_kv[None], (B_,) + attn_kv.shape)
    N_kv = akv.shape[1]
    d = C // mod.heads

    def lin(a2d, w, b):
        return jnp.dot(a2d.astype(jnp.bfloat16), w.T.astype(jnp.bfloat16),
                       preferred_element_type=jnp.float32) + b

    q2d = lin(x.reshape(B_ * N, C), mod.wq, mod.bq)
    kv2d = lin(akv.reshape(B_ * N_kv, C), mod.wkv, mod.bkv)
    q = q2d.reshape(B_, N, 1, mod.heads, d).transpose(2, 0, 3, 1, 4)[0]
    kv = kv2d.reshape(B_, N_kv, 2, mod.heads, d).transpose(2, 0, 3, 1, 4)
    return q, kv[0], kv[1]


if __name__ == "__main__":
    # Small shapes consistent with the module: torch's reshape (C // heads)
    # requires dim == heads * dim_head.
    B, N = 2, 8
    heads, dim_head = 4, 8
    dim = heads * dim_head  # 32
    N_kv = 6

    root = jax.random.PRNGKey(0)
    k_x, k_kv, k_params = jax.random.split(root, 3)
    x = jax.random.normal(k_x, (B, N, dim), jnp.float32)
    attn_kv = jax.random.normal(k_kv, (N_kv, dim), jnp.float32)

    mod = LinearProjection(dim, heads=heads, dim_head=dim_head, bias=True, key=k_params)

    # Self-attention path (fused [q|k|v] matmul, single-K-step kernel).
    q, k, v = mod(x)
    jax.block_until_ready((q, k, v))
    assert q.shape == (B, heads, N, dim // heads)
    assert k.shape == (B, heads, N, dim // heads)
    assert v.shape == (B, heads, N, dim // heads)
    q_ref, k_ref, v_ref = _reference(x, mod)
    assert jnp.allclose(q, q_ref, atol=2e-3, rtol=2e-3)
    assert jnp.allclose(k, k_ref, atol=2e-3, rtol=2e-3)
    assert jnp.allclose(v, v_ref, atol=2e-3, rtol=2e-3)

    # Cross-attention path (kv projected once, output broadcast over batch).
    q2, k2, v2 = mod(x, attn_kv=attn_kv)
    jax.block_until_ready((q2, k2, v2))
    assert q2.shape == (B, heads, N, dim // heads)
    assert k2.shape == (B, heads, N_kv, dim // heads)
    assert v2.shape == (B, heads, N_kv, dim // heads)
    q2_ref, k2_ref, v2_ref = _reference(x, mod, attn_kv=attn_kv)
    assert jnp.allclose(q2, q2_ref, atol=2e-3, rtol=2e-3)
    assert jnp.allclose(k2, k2_ref, atol=2e-3, rtol=2e-3)
    assert jnp.allclose(v2, v2_ref, atol=2e-3, rtol=2e-3)

    print("KERNEL_OK")
</pallas_src>

<mosaic_0001>
module attributes {stable_mosaic.version = 11 : i64} {
  func.func @_matmul_bias_kernel(%arg0: i32, %arg1: i32, %arg2: memref<16x32xbf16, #tpu.memory_space<vmem>>, %arg3: memref<32x384xbf16, #tpu.memory_space<vmem>>, %arg4: memref<1x384xf32, #tpu.memory_space<vmem>>, %arg5: memref<16x384xf32, #tpu.memory_space<vmem>>) attributes {dimension_semantics = [#tpu.dimension_semantics<parallel>, #tpu.dimension_semantics<parallel>], iteration_bounds = array<i64: 1, 1>, scalar_prefetch = 0 : i64, scratch_operands = 0 : i64, tpu.core_type = #tpu.core_type<tc>, window_params = [{transform_indices = @transform_0, window_bounds = array<i64: 16, 32>}, {transform_indices = @transform_1, window_bounds = array<i64: 32, 384>}, {transform_indices = @transform_2, window_bounds = array<i64: 1, 384>}, {transform_indices = @transform_3, window_bounds = array<i64: 16, 384>}]} {
    %c0 = arith.constant 0 : index
    %c0_0 = arith.constant 0 : index
    %0 = vector.load %arg2[%c0, %c0_0] : memref<16x32xbf16, #tpu.memory_space<vmem>>, vector<16x32xbf16>
    %c0_1 = arith.constant 0 : index
    %c0_2 = arith.constant 0 : index
    %1 = vector.load %arg3[%c0_1, %c0_2] : memref<32x384xbf16, #tpu.memory_space<vmem>>, vector<32x384xbf16>
    %cst = arith.constant dense<0.000000e+00> : vector<16x384xf32>
    %2 = tpu.matmul %0, %1, %cst {dimension_numbers = #tpu.dot_dimension_numbers<[1], [0], [0], [1], [0, 0, 1, 1], [], []>} : vector<16x32xbf16>, vector<32x384xbf16>, vector<16x384xf32> -> vector<16x384xf32>
    %c0_3 = arith.constant 0 : index
    %c0_4 = arith.constant 0 : index
    %3 = vector.load %arg4[%c0_3, %c0_4] : memref<1x384xf32, #tpu.memory_space<vmem>>, vector<1x384xf32>
    %4 = vector.broadcast %3 : vector<1x384xf32> to vector<16x384xf32>
    %5 = arith.addf %2, %4 : vector<16x384xf32>
    %c0_5 = arith.constant 0 : index
    %c0_6 = arith.constant 0 : index
    %6 = vector.load %arg5[%c0_5, %c0_6] : memref<16x384xf32, #tpu.memory_space<vmem>>, vector<16x384xf32>
    tpu.vector_store %arg5[%c0_5, %c0_6], %5 {strides = array<i32>} : memref<16x384xf32, #tpu.memory_space<vmem>>, vector<16x384xf32>,
    return
  }
  func.func @transform_0(%arg0: i32, %arg1: i32) -> (i32, i32) {
    %c0_i32 = arith.constant 0 : i32
    %c0_i32_0 = arith.constant 0 : i32
    return %arg0, %c0_i32 : i32, i32
  }
  func.func @transform_1(%arg0: i32, %arg1: i32) -> (i32, i32) {
    %c0_i32 = arith.constant 0 : i32
    %c0_i32_0 = arith.constant 0 : i32
    return %c0_i32, %arg1 : i32, i32
  }
  func.func @transform_2(%arg0: i32, %arg1: i32) -> (i32, i32) {
    %c0_i32 = arith.constant 0 : i32
    %c0_i32_0 = arith.constant 0 : i32
    return %c0_i32, %arg1 : i32, i32
  }
  func.func @transform_3(%arg0: i32, %arg1: i32) -> (i32, i32) {
    %c0_i32 = arith.constant 0 : i32
    return %arg0, %arg1 : i32, i32
  }
}

</mosaic_0001>

<bundles_post_ra>
// kernel: linear_bias.1
= control target key start
LH: loop header
LB: loop body
LE: loop exit
PB: predicated region body
PF: predicated region fallthrough
CT: control target
= control target key end

     0   :  { %8 = vsyncpa [#allocation3], 0  ;;  %s350_s0 = inlined_call_operand.vmem [shape: bf16[16,32], index: 0, kind: input, shape index: {}]   ;;  %s351_s1 = inlined_call_operand.hbm [shape: bf16[32,384], index: 1, kind: input, shape index: {}]   ;;  %s352_s2 = inlined_call_operand.vmem [shape: f32[1,384], index: 2, kind: input, shape index: {}]   ;;  %s353_s3 = inlined_call_operand.hbm [shape: f32[16,384], index: 3, kind: output, shape index: {}]  }
   0x1   :  { %9 = vsyncpa [#allocation4], 0  ;;  %s291_s12 = smov [#allocation2]   ;;  %s243_s16 = scalar_lea.hbm %s351_s1, 768 }
   0x2   :  { %s17_s13 = sshll.u32 %s291_s12, 4  ;;  %p244_p0 = scmp.ne.s32.totalorder %s351_s1, %s243_s16  ;;  %s18_s13 = int_to_ptr.vmem [resolvable:$true] %s17_s13 }
   0x3   :  { %p247_p1 = scmp.lt.u32.totalorder %s243_s16, %s351_s1 }
   0x5   :  { %p249_p2 = pnand %p247_p1, %p244_p0 }
   0x7   :  { %252 = shalt.err (!%p249_p2)
}
   0x8   :  { %s253_s21 = scalar_lea.vmem %s18_s13, 768  ;;  %p258_p4 = scmp.lt.s32.totalorder %s18_s13, %s18_s13 }
   0x9   :  { %p254_p3 = scmp.ne.s32.totalorder %s18_s13, %s253_s21  ;;  %p259_p5 = scmp.lt.s32.totalorder %s253_s21, %s253_s21 }
   0xb   :  { %p260_p6 = por %p259_p5, %p258_p4 }
   0xd   :  { %p261_p7 = pnand %p260_p6, %p254_p3 }
   0xf   :  { %264 = shalt.err (!%p261_p7)
}
  0x10   :  { %s292_s22 = smov 192   ;;  %s293_s23 = smov 12  }
  0x11   :  { %23 = dma.hbm_to_vmem [thread:$0]  %s351_s1, 768, %s18_s13, [#allocation3], %s292_s22, %s292_s22, %s293_s23  }
  0x12   :  { %287 = dma.done.wait [#allocation3], 768  }
  0x13   :  { %288 = vsyncadd [#allocation3], 4294966528  ;;  %v294_v0 = vmov 0.0   ;;  %vm295_vm0 = vmmov 0   ;;  %v296_v1 = vmov 0   ;;  %v242_v8 = vld [vmem:[%s350_s0] sm:$0xff]   ;;  %v42_v9 = vlaneseq }
  0x14   :  { %217 = vmatprep.subr.bf16.mxu1 %v294_v0  ;;  %221 = vmatprep.mubr.msk.bf16.mxu1 %vm295_vm0, %v294_v0  ;;  %v234_v2 = vld [vmem:[#allocation2 + $0x4] ss:$12 sps:$4 sm:$0xff]   ;;  %v236_v3 = vld [vmem:[#allocation2 + $0x8] ss:$12 sps:$4 sm:$0xff]   ;;  %v237_v4 = vld [vmem:[#allocation2] ss:$12 sps:$4 sm:$0xff]  }
  0x15   :  { %130 = vmatprep.mubr.bf16.mxu0 %v296_v1  ;;  %98 = vmatprep.subr.bf16.mxu0 %v234_v2  ;;  %v238_v5 = vld [vmem:[#allocation2 + $0x1c] ss:$12 sps:$4 sm:$0xff]   ;;  %v240_v6 = vld [vmem:[#allocation2 + $0x20] ss:$12 sps:$4 sm:$0xff]   ;;  %v241_v7 = vld [vmem:[#allocation2 + $0x18] ss:$12 sps:$4 sm:$0xff]  }
  0x16   :  { %218 = vmatpush3.bf16.msra.mxu1 %v236_v3  ;;  %99 = vmatpush1.bf16.msra.mxu0 %v237_v4  ;;  %vm94_vm1 = vcmask 261120   ;;  %v43_v10 = vshrl.u32 %v42_v9, 7  ;;  %v40_v12 = vld [vmem:[%s352_s2] sm:$0x7]  ;;  %s297_s0 = smov [#allocation5]  }
  0x17   :  { %219 = vmatprep.subr.bf16.mxu1 %v294_v0  ;;  %100 = vmatprep.subr.bf16.mxu0 %v238_v5  ;;  %s193_s29 = sshll.u32 %s297_s0, 4  ;;  %s194_s29 = int_to_ptr.vmem [resolvable:$true] %s193_s29 }
  0x18   :  { %v52_v11 = vsub.s32 2, %v43_v10  ;;  %v44_v13 = vsub.s32 0, %v43_v10  ;;  %v48_v14 = vsub.s32 1, %v43_v10  ;;  %s265_s2 = scalar_lea.vmem %s194_s29, 768  ;;  %p270_p9 = scmp.lt.s32.totalorder %s194_s29, %s194_s29 }
  0x19   :  { %p266_p8 = scmp.ne.s32.totalorder %s194_s29, %s265_s2  ;;  %p271_p10 = scmp.lt.s32.totalorder %s265_s2, %s265_s2 }
  0x1a   :  { %220 = vmatpush3.bf16.msra.mxu1 %v240_v6  ;;  %101 = vmatpush1.bf16.msra.mxu0 %v241_v7  ;;  %v53_v15 = vrot.slane %v40_v12, %v52_v11  ;;  %v45_v16 = vrot.slane %v40_v12, %v44_v13  ;;  %v49_v17 = vrot.slane %v40_v12, %v48_v14 }
  0x1b   :  { %p272_p11 = por %p271_p10, %p270_p9 }
  0x1d   :  { %222 = vmatmul.mubr.msk.bf16.vlgmr.msra.gmra.mrb[0].mxu1 %vm94_vm1, %v242_v8  ;;  %212 = vmatmul.mubr.msk.bf16.vlgmr.msra.gmra.mrb[0].mxu0 %vm94_vm1, %v242_v8  ;;  %p273_p12 = pnand %p272_p11, %p266_p8 }
  0xf0   :  { %v175_v18 = vpop.f32.mrb[0].mxu1  ;;  %v132_v20 = vpop.f32.mrb[0].mxu0 }
  0xf1   :  { %v176_v19 = vadd.f32 %v175_v18, %v53_v15  ;;  %v223_v21 = vpop.f32.mrb[1].mxu1  ;;  %v133_v22 = vadd.f32 %v132_v20, %v45_v16  ;;  %v134_v23 = vpop.f32.mrb[1].mxu0 }
  0xf2   :  { %v178_v24 = vpop.f32.mrb[2].mxu1  ;;  %v135_v25 = vadd.f32 %v134_v23, %v49_v17  ;;  %v136_v27 = vpop.f32.mrb[2].mxu0 }
  0xf3   :  { %184 = vst [vmem:[#allocation5 + $0x10] sm:$0xff] %v176_v19  ;;  %v179_v26 = vadd.f32 %v178_v24, %v53_v15  ;;  %v224_v28 = vpop.f32.mrb[3].mxu1  ;;  %182 = vst [vmem:[#allocation5] sm:$0xff] %v133_v22  ;;  %v137_v29 = vadd.f32 %v136_v27, %v45_v16  ;;  %v138_v30 = vpop.f32.mrb[3].mxu0 }
  0xf4   :  { %183 = vst [vmem:[#allocation5 + $0x8] sm:$0xff] %v135_v25  ;;  %v139_v31 = vadd.f32 %v138_v30, %v49_v17 }
  0xf5   :  { %187 = vst [vmem:[#allocation5 + $0x28] sm:$0xff] %v179_v26  ;;  %185 = vst [vmem:[#allocation5 + $0x18] sm:$0xff] %v137_v29 }
  0xf6   :  { %186 = vst [vmem:[#allocation5 + $0x20] sm:$0xff] %v139_v31 }
  0xf7   :  { %276 = shalt.err (!%p273_p12)
}
  0xf8   :  { %s277_s5 = scalar_lea.hbm %s353_s3, 768 }
  0xf9   :  { %p278_p13 = scmp.ne.s32.totalorder %s353_s3, %s277_s5  ;;  %p281_p0 = scmp.lt.u32.totalorder %s277_s5, %s353_s3 }
  0xfb   :  { %p283_p1 = pnand %p281_p0, %p278_p13 }
  0xfd   :  { %286 = shalt.err (!%p283_p1)
}
  0xfe   :  { %s298_s10 = smov 384   ;;  %s299_s11 = smov 24  }
  0xff   :  { %199 = dma.vmem_to_hbm [thread:$0]  %s194_s29, 768, %s353_s3, [#allocation4], %s298_s10, %s298_s10, %s299_s11  }
 0x100   :  { %289 = dma.done.wait [#allocation4], 768  }
 0x101   :  { %290 = vsyncadd [#allocation4], 4294966528 }
 0x102   :  { %203 = vsyncpa [#allocation3], 1 }
 0x103   :  { %204 = vsyncpa [#allocation4], 1 }

</bundles_post_ra>
